<compile_context>
chip_gen: v7x
topology: tpu7x:2x2x1
jax: 0.10.0
libtpu: 0.0.40
codegen_flags: <defaults>
</compile_context>

<pallas_src>
import functools

import jax
import jax.numpy as jnp
from jax import lax
from jax.experimental import pallas as pl
from jax.experimental.pallas import tpu as pltpu

_LANE = 128
_SUBLANE = 8
_MAX_TILE_ROWS = 2048  # 1 MiB per f32 input block


def _round_up(x, m):
    return ((x + m - 1) // m) * m


def _pick_chunk(tile_rows):
    """Largest of (32, 16, 8) rows that divides tile_rows (tile_rows is a multiple of 8)."""
    for c in (32, 16, 8):
        if tile_rows % c == 0:
            return c
    return tile_rows  # unreachable: tile_rows is always a multiple of 8


def _ce_partial_kernel(yh_ref, y_ref, out_ref, *, eps, tile_rows, chunk,
                       valid_rows, mask_tail):
    """Per-tile partial sums of -(y+eps)*log(y_hat+eps), emitted as an (8,128) block.

    Streams `chunk`-row slices through a small f32 accumulator (few live vregs).
    The tail block (if tile_rows does not divide the row count) is masked in-kernel.
    """
    nchunks = tile_rows // chunk
    if mask_tail:
        # Rows of this block that are inside the real array (may exceed tile_rows
        # for non-tail blocks; the compare below handles that naturally).
        limit = valid_rows - pl.program_id(0) * tile_rows
        row_iota = lax.broadcasted_iota(jnp.int32, (chunk, 1), 0)  # hoisted out of loop

    def body(c, acc):
        r0 = pl.multiple_of(c * chunk, chunk)
        yh = yh_ref[pl.ds(r0, chunk), :].astype(jnp.float32)
        yv = y_ref[pl.ds(r0, chunk), :].astype(jnp.float32)
        term = -(yv + eps) * jnp.log(yh + eps)
        if mask_tail:
            term = jnp.where((row_iota + r0) < limit, term, 0.0)
        return acc + term

    acc = lax.fori_loop(0, nchunks, body,
                        jnp.zeros((chunk, _LANE), jnp.float32),
                        unroll=min(nchunks, 8))
    # One small sublane-group reduce per grid step (not per chunk).
    out_ref[...] = acc.reshape(-1, _SUBLANE, _LANE).sum(axis=0)


def _ce_elementwise_kernel(yh_ref, y_ref, out_ref, *, eps, tile_rows, chunk):
    """Elementwise loss for reduction='none' (chunked load/compute/store)."""
    nchunks = tile_rows // chunk

    def body(c, carry):
        r0 = pl.multiple_of(c * chunk, chunk)
        yh = yh_ref[pl.ds(r0, chunk), :].astype(jnp.float32)
        yv = y_ref[pl.ds(r0, chunk), :].astype(jnp.float32)
        out_ref[pl.ds(r0, chunk), :] = (-(yv + eps) * jnp.log(yh + eps)).astype(out_ref.dtype)
        return carry

    lax.fori_loop(0, nchunks, body, 0, unroll=min(nchunks, 8))


def _prep(y_hat, y, eps):
    """Flatten to a lane-dense (rows, 128) slab with MINIMAL padding; pick tiling."""
    total = y.size
    rows = pl.cdiv(total, _LANE)
    padded = rows * _LANE != total

    yh_flat = jnp.ravel(y_hat)
    y_flat = jnp.ravel(y)
    if padded:
        # Tiny pad (< 128 elements), only when the element count isn't lane-aligned.
        #   y pad     = -eps => (y + eps) == 0 exactly in f32 => zero contribution
        #               (with bf16 inputs the rounding leaves ~1e-18/elem: negligible).
        #   y_hat pad = 1.0  => log stays finite.
        pad = rows * _LANE - total
        yh_flat = jnp.pad(yh_flat, (0, pad), constant_values=1.0)
        y_flat = jnp.pad(y_flat, (0, pad), constant_values=-eps)

    # Tile rows: multiple of 8, capped, and guaranteeing >= 2 grid steps whenever
    # possible so the "parallel" axis can feed both v7x TensorCores.
    half = _round_up(pl.cdiv(rows, 2), _SUBLANE)
    tile_rows = max(_SUBLANE, min(_MAX_TILE_ROWS, half))
    num_tiles = pl.cdiv(rows, tile_rows)

    return (yh_flat.reshape(rows, _LANE), y_flat.reshape(rows, _LANE),
            total, rows, tile_rows, num_tiles, padded)


def cross_entropy_loss(y_hat_batch, y, reduction="mean", eps=1e-8):
    """Pallas-TPU forward of the general CrossEntropyLoss module."""
    assert y_hat_batch.shape == y.shape
    out_dtype = jnp.promote_types(y_hat_batch.dtype, y.dtype)
    yh2, y2, total, rows, tile_rows, num_tiles, padded = _prep(y_hat_batch, y, eps)
    chunk = _pick_chunk(tile_rows)
    mask_tail = (rows % tile_rows) != 0

    in_specs = [
        pl.BlockSpec((tile_rows, _LANE), lambda g: (g, 0)),
        pl.BlockSpec((tile_rows, _LANE), lambda g: (g, 0)),
    ]
    cparams = pltpu.CompilerParams(dimension_semantics=("parallel",))

    if reduction == "none":
        out = pl.pallas_call(
            functools.partial(_ce_elementwise_kernel, eps=eps,
                              tile_rows=tile_rows, chunk=chunk),
            out_shape=jax.ShapeDtypeStruct((rows, _LANE), out_dtype),
            grid=(num_tiles,),
            in_specs=in_specs,
            out_specs=pl.BlockSpec((tile_rows, _LANE), lambda g: (g, 0)),
            compiler_params=cparams,
        )(yh2, y2)
        if padded:
            # Rare path: element count not a multiple of 128.
            return out.reshape(-1)[:total].reshape(y.shape)
        return out.reshape(y.shape)

    # reduction == 'mean' or 'sum': lane-dense per-tile partial sums, no carried
    # accumulator (grid axis fully parallel), tiny final reduce in plain JAX.
    partials = pl.pallas_call(
        functools.partial(_ce_partial_kernel, eps=eps, tile_rows=tile_rows,
                          chunk=chunk, valid_rows=rows, mask_tail=mask_tail),
        out_shape=jax.ShapeDtypeStruct((num_tiles * _SUBLANE, _LANE), jnp.float32),
        grid=(num_tiles,),
        in_specs=in_specs,
        out_specs=pl.BlockSpec((_SUBLANE, _LANE), lambda g: (g, 0)),
        compiler_params=cparams,
    )(yh2, y2)

    total_sum = jnp.sum(partials, dtype=jnp.float32)
    if reduction == "sum":
        return total_sum.astype(out_dtype)
    # 'mean': divide by the ORIGINAL element count (padding contributes ~0).
    return (total_sum / total).astype(out_dtype)


def _reference(y_hat, y, reduction="mean", eps=1e-8):
    loss = -((y.astype(jnp.float32) + eps) * jnp.log(y_hat.astype(jnp.float32) + eps))
    if reduction == "mean":
        return jnp.mean(loss)
    if reduction == "sum":
        return jnp.sum(loss)
    return loss


if __name__ == "__main__":
    key = jax.random.PRNGKey(0)
    k1, k2 = jax.random.split(key)
    shape = (2, 4, 16, 16)          # batch=2, channels=4, spatial=16x16
    B = shape[0]

    # "y_hat_batch and y each sum to 1": build per-sample probability maps.
    y_hat = jax.nn.softmax(
        jax.random.normal(k1, shape, dtype=jnp.float32).reshape(B, -1), axis=-1
    ).reshape(shape)
    y = jax.nn.softmax(
        jax.random.normal(k2, shape, dtype=jnp.float32).reshape(B, -1), axis=-1
    ).reshape(shape)

    # default reduction='mean'
    loss = cross_entropy_loss(y_hat, y)
    jax.block_until_ready(loss)
    ref = _reference(y_hat, y)
    assert jnp.allclose(loss, ref, rtol=1e-5, atol=1e-7), (loss, ref)

    # reduction='sum'
    loss_sum = cross_entropy_loss(y_hat, y, reduction="sum")
    jax.block_until_ready(loss_sum)
    ref_sum = _reference(y_hat, y, reduction="sum")
    assert jnp.allclose(loss_sum, ref_sum, rtol=1e-5, atol=1e-6), (loss_sum, ref_sum)

    # reduction='none'
    loss_none = cross_entropy_loss(y_hat, y, reduction="none")
    jax.block_until_ready(loss_none)
    ref_none = _reference(y_hat, y, reduction="none")
    assert jnp.allclose(loss_none, ref_none, rtol=1e-5, atol=1e-7)

    print("KERNEL_OK")
</pallas_src>

<mosaic_0001>
module attributes {stable_mosaic.version = 11 : i64} {
  func.func @_ce_partial_kernel(%arg0: i32, %arg1: memref<8x128xf32, #tpu.memory_space<vmem>>, %arg2: memref<8x128xf32, #tpu.memory_space<vmem>>, %arg3: memref<8x128xf32, #tpu.memory_space<vmem>>) attributes {dimension_semantics = [#tpu.dimension_semantics<parallel>], iteration_bounds = array<i64: 2>, scalar_prefetch = 0 : i64, scratch_operands = 0 : i64, tpu.core_type = #tpu.core_type<tc>, window_params = [{transform_indices = @transform_0, window_bounds = array<i64: 8, 128>}, {transform_indices = @transform_1, window_bounds = array<i64: 8, 128>}, {transform_indices = @transform_2, window_bounds = array<i64: 8, 128>}]} {
    %cst = arith.constant 0.000000e+00 : f32
    %0 = vector.broadcast %cst : f32 to vector<8x128xf32>
    %c0_i32 = arith.constant 0 : i32
    %c8_i32 = arith.constant 8 : i32
    %1 = arith.muli %c0_i32, %c8_i32 : i32
    %2 = tpu.assume_multiple %1, 8 : i32
    %3 = arith.index_cast %2 : i32 to index
    %c0 = arith.constant 0 : index
    %4 = vector.load %arg1[%3, %c0] : memref<8x128xf32, #tpu.memory_space<vmem>>, vector<8x128xf32>
    %5 = arith.index_cast %2 : i32 to index
    %c0_0 = arith.constant 0 : index
    %6 = vector.load %arg2[%5, %c0_0] : memref<8x128xf32, #tpu.memory_space<vmem>>, vector<8x128xf32>
    %cst_1 = arith.constant 9.99999993E-9 : f32
    %7 = vector.broadcast %cst_1 : f32 to vector<8x128xf32>
    %8 = arith.addf %6, %7 : vector<8x128xf32>
    %cst_2 = arith.constant 0.000000e+00 : f32
    %9 = vector.broadcast %cst_2 : f32 to vector<8x128xf32>
    %10 = arith.subf %9, %8 : vector<8x128xf32>
    %cst_3 = arith.constant 9.99999993E-9 : f32
    %11 = vector.broadcast %cst_3 : f32 to vector<8x128xf32>
    %12 = arith.addf %4, %11 : vector<8x128xf32>
    %13 = math.log %12 : vector<8x128xf32>
    %14 = arith.mulf %10, %13 : vector<8x128xf32>
    %15 = arith.addf %0, %14 : vector<8x128xf32>
    %c1_i32 = arith.constant 1 : i32
    %16 = vector.shape_cast %15 : vector<8x128xf32> to vector<1x8x128xf32>
    %cst_4 = arith.constant dense<0.000000e+00> : vector<8x128xf32>
    %17 = vector.multi_reduction <add>, %16, %cst_4 [0] : vector<1x8x128xf32> to vector<8x128xf32>
    %c0_5 = arith.constant 0 : index
    %c0_6 = arith.constant 0 : index
    %18 = vector.load %arg3[%c0_5, %c0_6] : memref<8x128xf32, #tpu.memory_space<vmem>>, vector<8x128xf32>
    tpu.vector_store %arg3[%c0_5, %c0_6], %17 {strides = array<i32>} : memref<8x128xf32, #tpu.memory_space<vmem>>, vector<8x128xf32>,
    return
  }
  func.func @transform_0(%arg0: i32) -> (i32, i32) {
    %c0_i32 = arith.constant 0 : i32
    %c0_i32_0 = arith.constant 0 : i32
    return %arg0, %c0_i32 : i32, i32
  }
  func.func @transform_1(%arg0: i32) -> (i32, i32) {
    %c0_i32 = arith.constant 0 : i32
    %c0_i32_0 = arith.constant 0 : i32
    return %arg0, %c0_i32 : i32, i32
  }
  func.func @transform_2(%arg0: i32) -> (i32, i32) {
    %c0_i32 = arith.constant 0 : i32
    %c0_i32_0 = arith.constant 0 : i32
    return %arg0, %c0_i32 : i32, i32
  }
}

</mosaic_0001>

<bundles_post_ra>
// kernel: tpu_custom_call.1
= control target key start
LH: loop header
LB: loop body
LE: loop exit
PB: predicated region body
PF: predicated region fallthrough
CT: control target
= control target key end

     0   :  { %7 = vsyncpa [#allocation3], 0  ;;  %s741_s0 = inlined_call_operand.hbm [shape: f32[16,128], index: 0, kind: input, shape index: {}]   ;;  %s742_s1 = inlined_call_operand.hbm [shape: f32[16,128], index: 1, kind: input, shape index: {}]   ;;  %s743_s2 = inlined_call_operand.hbm [shape: f32[16,128], index: 2, kind: output, shape index: {}]  }
   0x1   :  { %9 = vsyncpa [#allocation3 + $0x1], 0 }
   0x2   :  { %10 = vsyncpa [#allocation6], 0 }
   0x3   :  { %12 = vsyncpa [#allocation6 + $0x1], 0 }
   0x4   :  { %13 = vsyncpa [#allocation4], 0 }
   0x5   :  { %15 = vsyncpa [#allocation4 + $0x1], 0  ;;  %s532_s9 = smov 0   ;;  %s534_s10 = smov 0  }
   0x6   :  { %s536_s11 = smov 0   ;;  %s538_s12 = smov 0  }
   0x7 LB: > { %s553_s13 = sadd.s32 4294967295, %s512_s12   ;;  %s314_s14 = sadd.s32 4294967294, %s512_s12   ;;  %s512_s12 = sphi %s538_s12, %s762_s12   ;;  %s508_s11 = sphi %s536_s11, %s761_s11   ;;  %s504_s10 = sphi %s534_s10, %s760_s10   ;;  %s500_s9 = sphi %s532_s9, %s759_s9  }
   0x8   : > { %s557_s15 = sadd.s32 1, %s512_s12   ;;  %s28_s16 = sadd.s32 1, %s508_s11 }
   0x9   : > { %s25_s17 = ssub.s32 %s512_s12, %s557_s15  ;;  %p35_p0 = scmp.ne.s32.totalorder %s508_s11, %s504_s10 }
   0xa   : > { %p26_p1 = scmp.eq.s32.totalorder %s25_s17, 0  ;;  %p36_p2 = scmp.eq.s32.totalorder %s512_s12, 0 }
   0xb   : > { %p41_p3 = scmp.ne.s32.totalorder %s504_s10, %s500_s9  ;;  %p42_p4 = scmp.eq.s32.totalorder %s553_s13, 0 }
   0xc   : > { %s569_s18 = scalar_select %p26_p1, %s508_s11, %s28_s16  }
   0xd   : > { %p571_p5 = por %p36_p2, %p35_p0  ;;  %p575_p6 = por %p42_p4, %p41_p3 }
   0xe   : > { %p91_p7 = scmp.eq.s32.totalorder %s553_s13, 1  ;;  %p97_p8 = scmp.eq.s32.totalorder %s314_s14, 1 }
   0xf   : > { %s747_s20 = scalar_select %p575_p6, 1, 0 }
  0x10   : > { %p346_p10 = scmp.lt.s32.totalorder %s512_s12, 2  ;;  %p582_p11 = por %p91_p7, %p35_p0 }
  0x11   : > { %p586_p12 = por %p97_p8, %p41_p3  ;;  %s591_s23 = sand.u32 1, %s508_s11  }
  0x12   : > { %s748_s21 = scalar_select %p582_p11, 1, 0 }
  0x13   : > { %s749_s22 = scalar_select %p586_p12, 1, 0 }
  0x14   : > { %s318_s24 = sshll.u32 %s512_s12, 7  ;;  %s317_s25 = sshll.u32 %s591_s23, 3 }
  0x15   : > { %s600_s28 = scalar_lea.hbm %s741_s0, %s318_s24  ;;  %s121_s29 = scalar_lea.vmem [#allocation2], %s317_s25 }
  0x16   : > { %s128_s30 = sshll.u32 %s121_s29, 4  ;;  %p606_p13 = pnand %p346_p10, %p571_p5  ;;  %s610_s30 = int_to_ptr.vmem [resolvable:$true] %s128_s30 }
  0x17   : > { %s118_s4 = scalar_lea.sflag [#allocation3], %s591_s23  ;;  %s382_s5 = scalar_lea.hbm %s600_s28, 128 }
  0x18   : > { %p383_p2 = scmp.ne.s32.totalorder %s600_s28, %s382_s5  ;;  %p384_p3 = pneg %p606_p13 }
  0x19   : > { %s387_s8 = scalar_lea.hbm %s741_s0, 256  ;;  %p388_p5 = scmp.lt.u32.totalorder %s600_s28, %s741_s0 }
  0x1a   : > { %p385_p4 = pnand %p384_p3, %p383_p2  ;;  %p389_p8 = scmp.lt.u32.totalorder %s387_s8, %s382_s5 }
  0x1b   : > { %p391_p9 = scmp.lt.u32.totalorder %s382_s5, %s600_s28 }
  0x1c   : > { %p386_p7 = pneg %p385_p4  ;;  %p390_p10 = por %p389_p8, %p388_p5 }
  0x1e   : > { %p392_p0 = por %p391_p9, %p390_p10 }
  0x20   : > { %p393_p1 = pnand %p392_p0, %p386_p7 }
  0x22   : > { %396 = shalt.err (!%p393_p1)
}
  0x23   : > { %s397_s17 = scalar_lea.vmem %s610_s30, 128  ;;  %s514_s19 = smov [#allocation2]  }
  0x24   : > { %p398_p2 = scmp.ne.s32.totalorder %s610_s30, %s397_s17  ;;  %s402_s26 = sshll.u32 %s514_s19, 4  ;;  %s403_s26 = int_to_ptr.vmem [resolvable:$false] %s402_s26 }
  0x25   : > { %s404_s27 = scalar_lea.vmem %s403_s26, 256  ;;  %p405_p11 = scmp.lt.s32.totalorder %s610_s30, %s403_s26 }
  0x26   : > { %p400_p4 = pnand %p398_p2, %p384_p3  ;;  %p406_p5 = scmp.lt.s32.totalorder %s404_s27, %s397_s17 }
  0x28   : > { %p401_p12 = pneg %p400_p4  ;;  %p407_p8 = por %p406_p5, %p405_p11 }
  0x2a   : > { %p408_p9 = pnand %p407_p8, %p401_p12 }
  0x2c   : > { %411 = shalt.err (!%p408_p9)
}
  0x2d   : > { %338 = dma.hbm_to_vmem [thread:$0]  (!%p606_p13), %s600_s28, 128, %s610_s30, %s118_s4  }
  0x2e   : > { %p751_p0 = scmp.lt.s32.totalorder %s512_s12, 3  ;;  %p752_p1 = scmp.ge.s32.totalorder %s512_s12, 1 }
  0x2f   : > { %s653_s7 = scalar_lea.hbm %s742_s1, %s318_s24  ;;  %s139_s8 = scalar_lea.vmem [#allocation5], %s317_s25 }
  0x30   : > { %p644_p7 = pnand %p752_p1, %p751_p0  ;;  %s146_s14 = sshll.u32 %s139_s8, 4  ;;  %s147_s14 = int_to_ptr.vmem [resolvable:$true] %s146_s14 }
  0x31   : > { %s136_s28 = scalar_lea.sflag [#allocation6], %s591_s23  ;;  %s412_s30 = scalar_lea.hbm %s653_s7, 128 }
  0x32   : > { %s753_s29 = scalar_select %p644_p7, 1, 0 }
  0x33   : > { %p413_p11 = scmp.ne.s32.totalorder %s653_s7, %s412_s30  ;;  %s417_s24 = scalar_lea.hbm %s742_s1, 256 }
  0x34   : > { %p418_p2 = scmp.lt.u32.totalorder %s653_s7, %s742_s1  ;;  %p419_p4 = scmp.lt.u32.totalorder %s417_s24, %s412_s30 }
  0x35   : > { %p415_p12 = pnand %p413_p11, %p384_p3  ;;  %p421_p8 = scmp.lt.u32.totalorder %s412_s30, %s653_s7 }
  0x36   : > { %p420_p5 = por %p419_p4, %p418_p2 }
  0x37   : > { %p416_p10 = pneg %p415_p12 }
  0x38   : > { %p422_p9 = por %p421_p8, %p420_p5 }
  0x3a   : > { %p423_p0 = pnand %p422_p9, %p416_p10 }
  0x3c   : > { %426 = shalt.err (!%p423_p0)
}
  0x3d   : > { %s427_s23 = scalar_lea.vmem %s147_s14, 128  ;;  %s515_s25 = smov [#allocation5]  }
  0x3e   : > { %p428_p1 = scmp.ne.s32.totalorder %s147_s14, %s427_s23  ;;  %s432_s26 = sshll.u32 %s515_s25, 4  ;;  %s433_s26 = int_to_ptr.vmem [resolvable:$false] %s432_s26 }
  0x3f   : > { %s434_s27 = scalar_lea.vmem %s433_s26, 256  ;;  %p435_p6 = scmp.lt.s32.totalorder %s147_s14, %s433_s26 }
  0x40   : > { %p430_p11 = pnand %p428_p1, %p384_p3  ;;  %p436_p7 = scmp.lt.s32.totalorder %s434_s27, %s427_s23 }
  0x42   : > { %p431_p12 = pneg %p430_p11  ;;  %p437_p2 = por %p436_p7, %p435_p6 }
  0x44   : > { %p438_p4 = pnand %p437_p2, %p431_p12 }
  0x46   : > { %441 = shalt.err (!%p438_p4)
}
  0x47   : > { %341 = dma.hbm_to_vmem [thread:$0]  (!%p606_p13), %s653_s7, 128, %s147_s14, %s136_s28  }
  0x48   : > { %p754_p10 = scmp.ne.s32.totalorder %s753_s29, 0 }
  0x49   : > { %s680_s5 = sand.u32 (!%p754_p10), 1, %s504_s10   ;;  %p755_p3 = scmp.ne.s32.totalorder (!%p754_p10), %s747_s20, 0 }
  0x4a   : > { %155 = sbr.rel (%p754_p10) target bundleno = 116 (0x74), region = 28  ;;  %s322_s6 = sshll.u32 (!%p754_p10), %s680_s5, 3 }
  0x4b   : > { %s158_s8 = scalar_lea.sflag (!%p754_p10), [#allocation3], %s680_s5  ;;  %s161_s30 = scalar_lea.vmem (!%p754_p10), [#allocation2], %s322_s6 }
  0x51   : > { %487 = dma.done.wait (%p755_p3), %s158_s8, 128  }
  0x52   : > { %489 = vsyncadd (%p755_p3), %s158_s8, 4294967168  ;;  %s167_s3 = scalar_lea.sflag [#allocation6], %s680_s5  ;;  %s170_s7 = scalar_lea.vmem [#allocation5], %s322_s6 }
  0x53   : > { %491 = dma.done.wait (%p755_p3), %s167_s3, 128  }
  0x54   : > { %493 = vsyncadd (%p755_p3), %s167_s3, 4294967168  ;;  %v196_v0 = vld [vmem:[%s161_s30] sm:$0xff]  ;;  %v197_v2 = vld [vmem:[%s170_s7] sm:$0xff]  ;;  %s195_s29 = scalar_lea.vmem [#allocation7], %s322_s6  ;;  %s326_s28 = sshll.u32 %s553_s13, 7 }
  0x55   : > { %v200_v1 = vadd.f32 1e-08, %v196_v0  ;;  %v198_v3 = vadd.f32 1e-08, %v197_v2  ;;  %s221_s14 = sshll.u32 %s195_s29, 4  ;;  %s699_s16 = scalar_lea.hbm %s743_s2, %s326_s28  ;;  %s694_s14 = int_to_ptr.vmem [resolvable:$true] %s221_s14 }
  0x56   : > { %s208_s24 = scalar_lea.sflag [#allocation4], %s680_s5  ;;  %s442_s17 = scalar_lea.vmem %s694_s14, 128 }
  0x57   : > { %380 = vlog2.f32 %v200_v1  ;;  %v199_v4 = vsub.f32 0.0, %v198_v3  ;;  %p443_p6 = scmp.ne.s32.totalorder %s694_s14, %s442_s17  ;;  %p756_p13 = scmp.ne.s32.totalorder %s748_s21, 0 }
  0x58   : > { %s516_s13 = smov [#allocation7]  }
  0x59   : > { %p444_p7 = pnand %p443_p6, %p756_p13  ;;  %s446_s19 = sshll.u32 %s516_s13, 4  ;;  %s447_s19 = int_to_ptr.vmem [resolvable:$false] %s446_s19 }
  0x5a   : > { %s448_s23 = scalar_lea.vmem %s447_s19, 256  ;;  %p449_p8 = scmp.lt.s32.totalorder %s694_s14, %s447_s19 }
  0x5b   : > { %p445_p5 = pneg %p444_p7  ;;  %p450_p9 = scmp.lt.s32.totalorder %s448_s23, %s442_s17 }
  0x5d   : > { %p451_p0 = por %p450_p9, %p449_p8 }
  0x5f   : > { %p452_p1 = pnand %p451_p0, %p445_p5 }
  0x61   : > { %v381_v5 = vpop.eup %380 }
  0x62   : > { %v202_v6 = vmul.f32 0.6931472, %v381_v5 }
  0x64   : > { %v203_v7 = vmul.f32 %v202_v6, %v199_v4 }
  0x66   : > { %206 = vst [vmem:[%s195_s29] sm:$0xff] %v203_v7 }
  0x67   : > { %455 = shalt.err (!%p452_p1)
}
  0x68   : > { %s456_s25 = scalar_lea.hbm %s699_s16, 128  ;;  %s460_s5 = scalar_lea.hbm %s743_s2, 256 }
  0x69   : > { %p457_p11 = scmp.ne.s32.totalorder %s699_s16, %s456_s25  ;;  %p461_p4 = scmp.lt.u32.totalorder %s699_s16, %s743_s2 }
  0x6a   : > { %p462_p10 = scmp.lt.u32.totalorder %s460_s5, %s456_s25  ;;  %p464_p6 = scmp.lt.u32.totalorder %s456_s25, %s699_s16 }
  0x6b   : > { %p458_p12 = pnand %p457_p11, %p756_p13 }
  0x6c   : > { %p463_p3 = por %p462_p10, %p461_p4 }
  0x6d   : > { %p459_p2 = pneg %p458_p12 }
  0x6e   : > { %p465_p7 = por %p464_p6, %p463_p3 }
  0x70   : > { %p466_p5 = pnand %p465_p7, %p459_p2 }
  0x72   : > { %469 = shalt.err (!%p466_p5)
}
  0x73   : > { %333 = dma.vmem_to_hbm [thread:$0]  (%p756_p13), %s694_s14, 128, %s699_s16, %s208_s24  }
  0x74 PF: > { %s233_s30 = sand.u32 1, %s500_s9   ;;  %p757_p8 = scmp.ne.s32.totalorder %s749_s22, 0 }
  0x75   : > { %p758_p9 = scmp.ge.s32.totalorder %s512_s12, 2  ;;  %s234_s3 = scalar_lea.sflag [#allocation4], %s233_s30 }
  0x77   : > { %p343_p0 = pnand %p758_p9, %p757_p8 }
  0x79   : > { %495 = dma.done.wait (!%p343_p0), %s234_s3, 128  }
  0x7a   : > { %497 = vsyncadd (!%p343_p0), %s234_s3, 4294967168  ;;  %p18_p1 = scmp.ge.s32.totalorder %s557_s15, 4   ;;  %s759_s9 = smov %s504_s10 }
  0x7b   : > { %s760_s10 = smov %s508_s11  ;;  %s761_s11 = smov %s569_s18 }
  0x7c   : > { %s762_s12 = smov %s557_s15  ;;  %20 = sbr.rel (!%p18_p1) target bundleno = 7 (0x7), region = 86 }
  0x83   :  { %239 = vsyncpa [#allocation3], 1 }
  0x84   :  { %241 = vsyncpa [#allocation3 + $0x1], 1 }
  0x85   :  { %242 = vsyncpa [#allocation6], 1 }
  0x86   :  { %244 = vsyncpa [#allocation6 + $0x1], 1 }
  0x87   :  { %245 = vsyncpa [#allocation4], 1 }
  0x88   :  { %247 = vsyncpa [#allocation4 + $0x1], 1 }

</bundles_post_ra>
